<compile_context>
chip_gen: v5e
topology: v5e:2x2
jax: 0.10.0
libtpu: 0.0.40
codegen_flags: <defaults>
</compile_context>

<pallas_src>
import math

import jax
import jax.numpy as jnp
from jax.experimental import pallas as pl
from jax.experimental.pallas import tpu as pltpu  # noqa: F401  (TPU namespace kept for clarity)

B, S, D = 3, 4, 512
INV_SCALE_FACTOR = 1.0 / math.sqrt(D)      # PyTorch divides by this ...
SCALE = 1.0 / INV_SCALE_FACTOR             # ... i.e. multiplies by sqrt(D)
DROPOUT_P = 0.3


def _attn_dropout_kernel(q_ref, k_ref, v_ref, u_ref, o_ref):
    # Fold the sqrt(D) scale into q before the first matmul (one VPU mul on
    # the (B,S,D) tile instead of a dependent mul on the MXU result path).
    q = q_ref[...] * jnp.float32(SCALE)      # (B, S, D)
    k = k_ref[...]                           # (B, S, D)
    v = v_ref[...]                           # (B, S, D)

    # scores = (q*scale) @ k^T per batch. Contract the last axis of both
    # operands so k.T is never materialized (no XLU transpose / relayout).
    s = jnp.einsum("bsd,btd->bst", q, k,
                   preferred_element_type=jnp.float32)   # (B, S, S)

    # Numerically stable softmax over the last dim.
    m = jnp.max(s, axis=-1, keepdims=True)
    e = jnp.exp(s - m)
    p = e * pl.reciprocal(jnp.sum(e, axis=-1, keepdims=True), approx=True)

    # Training-mode dropout: keep with prob (1-p), scale kept values by 1/(1-p).
    keep = u_ref[...] >= jnp.float32(DROPOUT_P)
    dropped = jnp.where(keep,
                        p * jnp.float32(1.0 / (1.0 - DROPOUT_P)),
                        jnp.float32(0.0))

    # output = dropout(softmax(scores)) @ v  -> one lane-dense (B,S,512) store.
    o_ref[...] = jnp.einsum("bst,btd->bsd", dropped, v,
                            preferred_element_type=jnp.float32
                            ).astype(o_ref.dtype)


def sdp_attention_dropout(q, k, v, dropout_u):
    """q, k, v: (B, S, D) float32; dropout_u: (B, S, S) uniform[0,1) float32."""
    assert q.shape == (B, S, D) and k.shape == (B, S, D) and v.shape == (B, S, D)
    assert dropout_u.shape == (B, S, S)
    # Single invocation, no grid: the whole problem (~100 KB) fits in VMEM on
    # every TPU generation, so per-grid-step overhead is eliminated entirely.
    return pl.pallas_call(
        _attn_dropout_kernel,
        out_shape=jax.ShapeDtypeStruct((B, S, D), jnp.float32),
    )(q, k, v, dropout_u)


if __name__ == "__main__":
    key = jax.random.PRNGKey(0)
    kq, kk, kv, kd = jax.random.split(key, 4)
    q = jax.random.normal(kq, (B, S, D), dtype=jnp.float32)
    k = jax.random.normal(kk, (B, S, D), dtype=jnp.float32)
    v = jax.random.normal(kv, (B, S, D), dtype=jnp.float32)
    # One uniform draw per attention probability; independent per batch.
    dropout_u = jax.random.uniform(kd, (B, S, S), dtype=jnp.float32)

    out = sdp_attention_dropout(q, k, v, dropout_u)
    out = jax.block_until_ready(out)

    assert out.shape == (B, S, D)
    assert bool(jnp.all(jnp.isfinite(out)))
    print("KERNEL_OK")
</pallas_src>

<mosaic_0001>
module attributes {stable_mosaic.version = 11 : i64} {
  func.func @_attn_dropout_kernel(%arg0: memref<3x4x512xf32, #tpu.memory_space<vmem>>, %arg1: memref<3x4x512xf32, #tpu.memory_space<vmem>>, %arg2: memref<3x4x512xf32, #tpu.memory_space<vmem>>, %arg3: memref<3x4x4xf32, #tpu.memory_space<vmem>>, %arg4: memref<3x4x512xf32, #tpu.memory_space<vmem>>) attributes {dimension_semantics = [], scalar_prefetch = 0 : i64, scratch_operands = 0 : i64, tpu.core_type = #tpu.core_type<tc>} {
    %c0 = arith.constant 0 : index
    %c0_0 = arith.constant 0 : index
    %c0_1 = arith.constant 0 : index
    %0 = vector.load %arg0[%c0, %c0_0, %c0_1] : memref<3x4x512xf32, #tpu.memory_space<vmem>>, vector<3x4x512xf32>
    %cst = arith.constant 22.6274166 : f32
    %1 = vector.broadcast %cst : f32 to vector<3x4x512xf32>
    %2 = arith.mulf %0, %1 : vector<3x4x512xf32>
    %c0_2 = arith.constant 0 : index
    %c0_3 = arith.constant 0 : index
    %c0_4 = arith.constant 0 : index
    %3 = vector.load %arg1[%c0_2, %c0_3, %c0_4] : memref<3x4x512xf32, #tpu.memory_space<vmem>>, vector<3x4x512xf32>
    %c0_5 = arith.constant 0 : index
    %c0_6 = arith.constant 0 : index
    %c0_7 = arith.constant 0 : index
    %4 = vector.load %arg2[%c0_5, %c0_6, %c0_7] : memref<3x4x512xf32, #tpu.memory_space<vmem>>, vector<3x4x512xf32>
    "tpu.trace_start"() <{level = 10 : i32, message = "bsd,btd->bst"}> : () -> ()
    %cst_8 = arith.constant dense<0.000000e+00> : vector<3x4x4xf32>
    %5 = tpu.matmul %2, %3, %cst_8 {dimension_numbers = #tpu.dot_dimension_numbers<[2], [2], [1], [1], [0, 0, 0, 1, 1, 1], [0], [0]>} : vector<3x4x512xf32>, vector<3x4x512xf32>, vector<3x4x4xf32> -> vector<3x4x4xf32>
    "tpu.trace_stop"() : () -> ()
    %cst_9 = arith.constant dense<0xFF800000> : vector<3x4xf32>
    %6 = vector.multi_reduction <maximumf>, %5, %cst_9 [2] : vector<3x4x4xf32> to vector<3x4xf32>
    %7 = vector.shape_cast %6 : vector<3x4xf32> to vector<3x4x1xf32>
    %8 = vector.broadcast %7 : vector<3x4x1xf32> to vector<3x4x4xf32>
    %9 = arith.subf %5, %8 : vector<3x4x4xf32>
    %10 = math.exp %9 : vector<3x4x4xf32>
    %cst_10 = arith.constant dense<0.000000e+00> : vector<3x4xf32>
    %11 = vector.multi_reduction <add>, %10, %cst_10 [2] : vector<3x4x4xf32> to vector<3x4xf32>
    %12 = vector.shape_cast %11 : vector<3x4xf32> to vector<3x4x1xf32>
    %13 = tpu.reciprocal %12 {approx = true} : vector<3x4x1xf32> -> vector<3x4x1xf32>
    %14 = vector.broadcast %13 : vector<3x4x1xf32> to vector<3x4x4xf32>
    %15 = arith.mulf %10, %14 : vector<3x4x4xf32>
    %c0_11 = arith.constant 0 : index
    %c0_12 = arith.constant 0 : index
    %c0_13 = arith.constant 0 : index
    %16 = vector.load %arg3[%c0_11, %c0_12, %c0_13] : memref<3x4x4xf32, #tpu.memory_space<vmem>>, vector<3x4x4xf32>
    %cst_14 = arith.constant 3.000000e-01 : f32
    %17 = vector.broadcast %cst_14 : f32 to vector<3x4x4xf32>
    %18 = arith.cmpf oge, %16, %17 : vector<3x4x4xf32>
    %cst_15 = arith.constant 1.42857146 : f32
    %19 = vector.broadcast %cst_15 : f32 to vector<3x4x4xf32>
    %20 = arith.mulf %15, %19 : vector<3x4x4xf32>
    %cst_16 = arith.constant 0.000000e+00 : f32
    %21 = vector.broadcast %cst_16 : f32 to vector<3x4x4xf32>
    %22 = arith.select %18, %20, %21 : vector<3x4x4xi1>, vector<3x4x4xf32>
    "tpu.trace_start"() <{level = 10 : i32, message = "bst,btd->bsd"}> : () -> ()
    %cst_17 = arith.constant dense<0.000000e+00> : vector<3x4x512xf32>
    %23 = tpu.matmul %22, %4, %cst_17 {dimension_numbers = #tpu.dot_dimension_numbers<[2], [1], [1], [2], [0, 0, 0, 1, 1, 2], [0], [0]>} : vector<3x4x4xf32>, vector<3x4x512xf32>, vector<3x4x512xf32> -> vector<3x4x512xf32>
    "tpu.trace_stop"() : () -> ()
    %c0_18 = arith.constant 0 : index
    %c0_19 = arith.constant 0 : index
    %c0_20 = arith.constant 0 : index
    %24 = vector.load %arg4[%c0_18, %c0_19, %c0_20] : memref<3x4x512xf32, #tpu.memory_space<vmem>>, vector<3x4x512xf32>
    tpu.vector_store %arg4[%c0_18, %c0_19, %c0_20], %23 {strides = array<i32>} : memref<3x4x512xf32, #tpu.memory_space<vmem>>, vector<3x4x512xf32>,
    return
  }
}

</mosaic_0001>

<bundles_post_ra>
// kernel: tpu_custom_call.1
= control target key start
LH: loop header
LB: loop body
LE: loop exit
PB: predicated region body
PF: predicated region fallthrough
CT: control target
= control target key end

     0   :  { %9 = vsyncpa [#allocation3], 0  ;;  %s1106_s0 = inlined_call_operand.hbm [shape: f32[3,4,512], index: 0, kind: input, shape index: {}]   ;;  %s1107_s1 = inlined_call_operand.hbm [shape: f32[3,4,512], index: 1, kind: input, shape index: {}]   ;;  %s1108_s2 = inlined_call_operand.hbm [shape: f32[3,4,512], index: 2, kind: input, shape index: {}]   ;;  %s1109_s3 = inlined_call_operand.hbm [shape: f32[3,4,4], index: 3, kind: input, shape index: {}]   ;;  %s1110_s4 = inlined_call_operand.hbm [shape: f32[3,4,512], index: 4, kind: output, shape index: {}]  }
   0x1   :  { %10 = vsyncpa [#allocation6], 0 }
   0x2   :  { %11 = vsyncpa [#allocation9], 0 }
   0x3   :  { %12 = vsyncpa [#allocation4], 0  ;;  %s30_s17 = sshll.u32 %s1107_s1, 4  ;;  %s1001_s18 = smov [#allocation5]   ;;  %s31_s17 = int_to_ptr.hbm [resolvable:$true] %s30_s17 }
   0x4   :  { %s32_s19 = sshll.u32 %s1001_s18, 4  ;;  %s17_s22 = sshll.u32 %s1106_s0, 4  ;;  %s33_s19 = int_to_ptr.vmem [resolvable:$true] %s32_s19  ;;  %s18_s22 = int_to_ptr.hbm [resolvable:$true] %s17_s22 }
   0x5   :  { %s1002_s23 = smov 256   ;;  %s1003_s24 = smov 16  }
   0x6   :  { %38 = dma.hbm_to_vmem [thread:$0]  %s31_s17, 768, %s33_s19, [#allocation6], %s1002_s23, %s1002_s23, %s1003_s24  }
   0x7   :  { %s1004_s25 = smov [#allocation2]   ;;  %s43_s1 = sshll.u32 %s1108_s2, 4  ;;  %s44_s1 = int_to_ptr.hbm [resolvable:$true] %s43_s1 }
   0x8   :  { %s19_s26 = sshll.u32 %s1004_s25, 4  ;;  %s56_s30 = sshll.u32 %s1109_s3, 4  ;;  %s20_s26 = int_to_ptr.vmem [resolvable:$true] %s19_s26  ;;  %s57_s30 = int_to_ptr.hbm [resolvable:$true] %s56_s30 }
   0x9   :  { %25 = dma.hbm_to_vmem [thread:$0]  %s18_s22, 768, %s20_s26, [#allocation3], %s1002_s23, %s1002_s23, %s1003_s24  }
   0xa   :  { %s1005_s5 = smov [#allocation7]   ;;  %s1006_s7 = smov [#allocation8]  }
   0xb   :  { %s45_s6 = sshll.u32 %s1005_s5, 4  ;;  %s58_s2 = sshll.u32 %s1006_s7, 4  ;;  %s46_s6 = int_to_ptr.vmem [resolvable:$true] %s45_s6  ;;  %s59_s2 = int_to_ptr.vmem [resolvable:$true] %s58_s2 }
   0xc   :  { %51 = dma.hbm_to_vmem [thread:$0]  %s44_s1, 768, %s46_s6, [#allocation6], %s1002_s23, %s1002_s23, %s1003_s24  }
   0xd   :  { %s1007_s8 = smov 64   ;;  %s1008_s9 = smov 4  }
   0xe   :  { %64 = dma.hbm_to_vmem [thread:$0]  %s57_s30, 192, %s59_s2, [#allocation9], %s1007_s8, %s1007_s8, %s1008_s9  }
   0xf   :  { %993 = dma.done.wait [#allocation3], 768  }
  0x10   :  { %994 = vsyncadd [#allocation3], 4294966528 }
  0x11   :  { %995 = dma.done.wait [#allocation6], 1536  }
  0x12   :  { %996 = vsyncadd [#allocation6], 4294965760 }
  0x13   :  { %997 = dma.done.wait [#allocation9], 192  }
  0x14   :  { %998 = vsyncadd [#allocation9], 4294967104  ;;  %v82_v0 = vld [vmem:[#allocation2 + $0x8] sm:$0xff]  ;;  %v81_v2 = vld [vmem:[#allocation2] sm:$0xff]  ;;  %vm423_vm0 = vcmask 27648   ;;  %vm482_vm1 = vcmask 1043456  }
  0x15   :  { %v88_v1 = vmul.f32 22.627417, %v82_v0  ;;  %v87_v3 = vmul.f32 22.627417, %v81_v2  ;;  %v94_v4 = vld [vmem:[#allocation5 + $0x8] sm:$0xff]  ;;  %v93_v5 = vld [vmem:[#allocation5] sm:$0xff] }
  0x16   :  { %v84_v9 = vld [vmem:[#allocation2 + $0x18] sm:$0xff]  ;;  %v83_v11 = vld [vmem:[#allocation2 + $0x10] sm:$0xff]  ;;  %v96_v18 = vld [vmem:[#allocation5 + $0x18] sm:$0xff]  ;;  %vm478_vm3 = vcmask 31744   ;;  %s1009_s3 = smov [#allocation10]   ;;  %s813_s13 = sshll.u32 %s1110_s4, 4  ;;  %s814_s13 = int_to_ptr.hbm [resolvable:$true] %s813_s13 }
  0x17   :  { %109 = vst [vmem:[#allocation1 + $0x10] ss:$2 sm:$0xff] %v88_v1  ;;  %v90_v12 = vmul.f32 22.627417, %v84_v9  ;;  %v89_v13 = vmul.f32 22.627417, %v83_v11 }
  0x18   :  { %107 = vst [vmem:[#allocation1] ss:$2 sm:$0xff] %v87_v3  ;;  %v95_v19 = vld [vmem:[#allocation5 + $0x10] sm:$0xff]  ;;  %v86_v22 = vld [vmem:[#allocation2 + $0x28] sm:$0xff]  ;;  %v98_v32 = vld [vmem:[#allocation5 + $0x28] sm:$0xff]  ;;  %s811_s10 = sshll.u32 %s1009_s3, 4  ;;  %s812_s10 = int_to_ptr.vmem [resolvable:$true] %s811_s10 }
  0x19   :  { %v85_v25 = vld [vmem:[#allocation2 + $0x20] sm:$0xff]  ;;  %v92_v26 = vmul.f32 22.627417, %v86_v22  ;;  %v97_v33 = vld [vmem:[#allocation5 + $0x20] sm:$0xff] }
  0x1a   :  { %v91_v27 = vmul.f32 22.627417, %v85_v25 }
  0x1e   :  { %v112_v6 = vld.sshfl [vmem:[#allocation1 + $0x10] sm:$0xff pattern:$0x75316420]  ;;  %v113_v7 = vld.sshfl [vmem:[#allocation1 + $0x18] sm:$0xff pattern:$0x75316420] }
  0x1f   :  { %122 = vst [vmem:[#allocation1 + $0x10] ss:$2 sm:$0xff] %v94_v4  ;;  %v110_v8 = vld.sshfl [vmem:[#allocation1] sm:$0xff pattern:$0x75316420] }
  0x20   :  { %v111_v10 = vld.sshfl [vmem:[#allocation1 + $0x8] sm:$0xff pattern:$0x75316420] }
  0x21   :  { %120 = vst [vmem:[#allocation1] ss:$2 sm:$0xff] %v93_v5 }
  0x26   :  { %v125_v14 = vld.sshfl [vmem:[#allocation1 + $0x10] sm:$0xff pattern:$0x75316420]  ;;  %v126_v15 = vld.sshfl [vmem:[#allocation1 + $0x18] sm:$0xff pattern:$0x75316420] }
  0x27   :  { %186 = vmatpush.xpose.msra.mxu2 %v125_v14  ;;  %206 = vmatpush.xpose.msra.mxu3 %v126_v15  ;;  %215 = vst [vmem:[#allocation1 + $0x10] ss:$2 sm:$0xff] %v90_v12 }
  0x28   :  { %v123_v16 = vld.sshfl [vmem:[#allocation1] sm:$0xff pattern:$0x75316420]  ;;  %v124_v17 = vld.sshfl [vmem:[#allocation1 + $0x8] sm:$0xff pattern:$0x75316420] }
  0x29   :  { %146 = vmatpush.xpose.msra.mxu0 %v123_v16  ;;  %166 = vmatpush.xpose.msra.mxu1 %v124_v17  ;;  %213 = vst [vmem:[#allocation1] ss:$2 sm:$0xff] %v89_v13  ;;  %v99_v17 = vld [vmem:[#allocation7] sm:$0xff] }
  0x2a   :  { %187 = vmatmul.f32.vlgmr.msra.gmra.mxu2 %v112_v6  ;;  %207 = vmatmul.f32.vlgmr.msra.gmra.mxu3 %v113_v7 }
  0x2c   :  { %147 = vmatmul.f32.vlgmr.msra.gmra.mxu0 %v110_v8  ;;  %167 = vmatmul.f32.vlgmr.msra.gmra.mxu1 %v111_v10 }
  0x2e   :  { %v218_v20 = vld.sshfl [vmem:[#allocation1 + $0x10] sm:$0xff pattern:$0x75316420]  ;;  %v219_v21 = vld.sshfl [vmem:[#allocation1 + $0x18] sm:$0xff pattern:$0x75316420] }
  0x2f   :  { %228 = vst [vmem:[#allocation1 + $0x10] ss:$2 sm:$0xff] %v96_v18  ;;  %v100_v18 = vld [vmem:[#allocation7 + $0x8] sm:$0xff] }
  0x30   :  { %v216_v23 = vld.sshfl [vmem:[#allocation1] sm:$0xff pattern:$0x75316420]  ;;  %v217_v24 = vld.sshfl [vmem:[#allocation1 + $0x8] sm:$0xff pattern:$0x75316420] }
  0x31   :  { %226 = vst [vmem:[#allocation1] ss:$2 sm:$0xff] %v95_v19 }
  0x36   :  { %v231_v28 = vld.sshfl [vmem:[#allocation1 + $0x10] sm:$0xff pattern:$0x75316420]  ;;  %v232_v29 = vld.sshfl [vmem:[#allocation1 + $0x18] sm:$0xff pattern:$0x75316420] }
  0x37   :  { %292 = vmatpush.xpose.msrb.mxu2 %v231_v28  ;;  %312 = vmatpush.xpose.msrb.mxu3 %v232_v29  ;;  %321 = vst [vmem:[#allocation1 + $0x10] ss:$2 sm:$0xff] %v92_v26 }
  0x38   :  { %v229_v30 = vld.sshfl [vmem:[#allocation1] sm:$0xff pattern:$0x75316420]  ;;  %v230_v31 = vld.sshfl [vmem:[#allocation1 + $0x8] sm:$0xff pattern:$0x75316420] }
  0x39   :  { %252 = vmatpush.xpose.msrb.mxu0 %v229_v30  ;;  %272 = vmatpush.xpose.msrb.mxu1 %v230_v31  ;;  %319 = vst [vmem:[#allocation1] ss:$2 sm:$0xff] %v91_v27  ;;  %v104_v30 = vld [vmem:[#allocation7 + $0x28] sm:$0xff]  ;;  %v103_v31 = vld [vmem:[#allocation7 + $0x20] sm:$0xff] }
  0x3a   :  { %293 = vmatmul.f32.vlgmr.msrb.gmra.mxu2 %v218_v20  ;;  %313 = vmatmul.f32.vlgmr.msrb.gmra.mxu3 %v219_v21 }
  0x3c   :  { %253 = vmatmul.f32.vlgmr.msrb.gmra.mxu0 %v216_v23  ;;  %273 = vmatmul.f32.vlgmr.msrb.gmra.mxu1 %v217_v24  ;;  %v101_v23 = vld [vmem:[#allocation7 + $0x10] sm:$0xff]  ;;  %v102_v24 = vld [vmem:[#allocation7 + $0x18] sm:$0xff] }
  0x3e   :  { %v324_v34 = vld.sshfl [vmem:[#allocation1 + $0x10] sm:$0xff pattern:$0x75316420]  ;;  %v325_v35 = vld.sshfl [vmem:[#allocation1 + $0x18] sm:$0xff pattern:$0x75316420] }
  0x3f   :  { %334 = vst [vmem:[#allocation1 + $0x10] ss:$2 sm:$0xff] %v98_v32  ;;  %v457_v32 = vld [vmem:[#allocation8] sm:$0xf] }
  0x40   :  { %v322_v36 = vld.sshfl [vmem:[#allocation1] sm:$0xff pattern:$0x75316420]  ;;  %v323_v37 = vld.sshfl [vmem:[#allocation1 + $0x8] sm:$0xff pattern:$0x75316420] }
  0x41   :  { %332 = vst [vmem:[#allocation1] ss:$2 sm:$0xff] %v97_v33  ;;  %vm460_vm2 = vcmp.ge.f32.partialorder %v457_v32, 0.3 }
  0x46   :  { %v337_v38 = vld.sshfl [vmem:[#allocation1 + $0x10] sm:$0xff pattern:$0x75316420]  ;;  %v338_v39 = vld.sshfl [vmem:[#allocation1 + $0x18] sm:$0xff pattern:$0x75316420] }
  0x47   :  { %398 = vmatpush.xpose.msra.mxu2 %v337_v38  ;;  %418 = vmatpush.xpose.msra.mxu3 %v338_v39  ;;  %473 = vst [vmem:[#allocation1 + $0x10] ss:$2 sm:$0xff] %v100_v18 }
  0x48   :  { %v335_v40 = vld.sshfl [vmem:[#allocation1] sm:$0xff pattern:$0x75316420]  ;;  %v336_v41 = vld.sshfl [vmem:[#allocation1 + $0x8] sm:$0xff pattern:$0x75316420] }
  0x49   :  { %358 = vmatpush.xpose.msra.mxu0 %v335_v40  ;;  %378 = vmatpush.xpose.msra.mxu1 %v336_v41  ;;  %471 = vst [vmem:[#allocation1] ss:$2 sm:$0xff] %v99_v17 }
  0x4a   :  { %399 = vmatmul.f32.vlgmr.msra.gmra.mxu2 %v324_v34  ;;  %419 = vmatmul.f32.vlgmr.msra.gmra.mxu3 %v325_v35 }
  0x4c   :  { %359 = vmatmul.f32.vlgmr.msra.gmra.mxu0 %v322_v36  ;;  %379 = vmatmul.f32.vlgmr.msra.gmra.mxu1 %v323_v37 }
  0x4e   :  { %v476_v21 = vld.sshfl [vmem:[#allocation1 + $0x10] sm:$0xff pattern:$0x75316420]  ;;  %v477_v22 = vld.sshfl [vmem:[#allocation1 + $0x18] sm:$0xff pattern:$0x75316420] }
  0x4f   :  { %832 = vmatpush.msk.msrb.mxu2 %vm482_vm1, %v476_v21  ;;  %834 = vmatpush.msk.msrb.mxu3 %vm482_vm1, %v477_v22  ;;  %575 = vst [vmem:[#allocation1 + $0x10] ss:$2 sm:$0xff] %v102_v24 }
  0x50   :  { %v474_v19 = vld.sshfl [vmem:[#allocation1] sm:$0xff pattern:$0x75316420]  ;;  %v475_v20 = vld.sshfl [vmem:[#allocation1 + $0x8] sm:$0xff pattern:$0x75316420] }
  0x51   :  { %828 = vmatpush.msk.msrb.mxu0 %vm482_vm1, %v474_v19  ;;  %830 = vmatpush.msk.msrb.mxu1 %vm482_vm1, %v475_v20  ;;  %573 = vst [vmem:[#allocation1] ss:$2 sm:$0xff] %v101_v23 }
  0x56   :  { %v578_v27 = vld.sshfl [vmem:[#allocation1 + $0x10] sm:$0xff pattern:$0x75316420]  ;;  %v579_v28 = vld.sshfl [vmem:[#allocation1 + $0x18] sm:$0xff pattern:$0x75316420] }
  0x57   :  { %840 = vmatpush.msk.msra.mxu2 %vm482_vm1, %v578_v27  ;;  %842 = vmatpush.msk.msra.mxu3 %vm482_vm1, %v579_v28  ;;  %675 = vst [vmem:[#allocation1 + $0x10] ss:$2 sm:$0xff] %v104_v30 }
  0x58   :  { %v576_v25 = vld.sshfl [vmem:[#allocation1] sm:$0xff pattern:$0x75316420]  ;;  %v577_v26 = vld.sshfl [vmem:[#allocation1 + $0x8] sm:$0xff pattern:$0x75316420] }
  0x59   :  { %836 = vmatpush.msk.msra.mxu0 %vm482_vm1, %v576_v25  ;;  %838 = vmatpush.msk.msra.mxu1 %vm482_vm1, %v577_v26  ;;  %673 = vst [vmem:[#allocation1] ss:$2 sm:$0xff] %v103_v31 }
  0x5e   :  { %v679_v37 = vld.sshfl [vmem:[#allocation1 + $0x18] sm:$0xff pattern:$0x75316420]  ;;  %v678_v40 = vld.sshfl [vmem:[#allocation1 + $0x10] sm:$0xff pattern:$0x75316420] }
  0x60   :  { %v676_v38 = vld.sshfl [vmem:[#allocation1] sm:$0xff pattern:$0x75316420]  ;;  %v677_v39 = vld.sshfl [vmem:[#allocation1 + $0x8] sm:$0xff pattern:$0x75316420] }
  0xa9   :  { %v148_v42 = vpop.f32.mrf.mxu0  ;;  %v168_v43 = vpop.f32.mrf.mxu1 }
  0xaa   :  { %v169_v44 = vadd.f32 %v168_v43, %v148_v42  ;;  %v458_v42 = vld [vmem:[#allocation8 + $0x4] sm:$0xf] }
  0xab   :  { %vm461_vm4 = vcmp.ge.f32.partialorder %v458_v42, 0.3 }
  0xad   :  { %v188_v45 = vpop.f32.mrf.mxu2  ;;  %v208_v46 = vpop.f32.mrf.mxu3 }
  0xae   :  { %v189_v47 = vadd.f32 %v188_v45, %v169_v44 }
  0xb0   :  { %v209_v48 = vadd.f32 %v208_v46, %v189_v47 }
  0xb2   :  { %v424_v49 = vsel %vm423_vm0, %v209_v48, -inf }
  0xb3   :  { %425 = vmax.xlane.f32.xlu0 %v424_v49 }
  0xb9   :  { %v254_v50 = vpop.f32.mrf.mxu0  ;;  %v274_v51 = vpop.f32.mrf.mxu1 }
  0xba   :  { %v275_v52 = vadd.f32 %v274_v51, %v254_v50 }
  0xbd   :  { %v294_v53 = vpop.f32.mrf.mxu2  ;;  %v314_v54 = vpop.f32.mrf.mxu3 }
  0xbe   :  { %v295_v55 = vadd.f32 %v294_v53, %v275_v52 }
  0xc0   :  { %v315_v56 = vadd.f32 %v314_v54, %v295_v55 }
  0xc2   :  { %v427_v57 = vsel %vm423_vm0, %v315_v56, -inf }
  0xc3   :  { %428 = vmax.xlane.f32.xlu0 %v427_v57 }
  0xc9   :  { %v360_v58 = vpop.f32.mrf.mxu0  ;;  %v380_v59 = vpop.f32.mrf.mxu1 }
  0xca   :  { %v381_v60 = vadd.f32 %v380_v59, %v360_v58 }
  0xcd   :  { %v400_v61 = vpop.f32.mrf.mxu2  ;;  %v420_v62 = vpop.f32.mrf.mxu3 }
  0xce   :  { %v401_v63 = vadd.f32 %v400_v61, %v381_v60 }
  0xd0   :  { %v421_v0 = vadd.f32 %v420_v62, %v401_v63 }
  0xd2   :  { %v430_v1 = vsel %vm423_vm0, %v421_v0, -inf }
  0xd3   :  { %431 = vmax.xlane.f32.xlu1 %v430_v1 }
 0x126   :  { %v426_v2 = vpop.xlane.xlu0 %425 }
 0x127   :  { %v433_v3 = vsub.f32 %v209_v48, %v426_v2  ;;  %v459_v48 = vld [vmem:[#allocation8 + $0x8] sm:$0xf] }
 0x128   :  { %vm462_vm5 = vcmp.ge.f32.partialorder %v459_v48, 0.3 }
 0x129   :  { %v436_v4 = vmul.f32 1.442695, %v433_v3 }
 0x12b   :  { %861 = vpow2.f32 %v436_v4 }
 0x131   :  { %v862_v5 = vpop.eup %861 }
 0x132   :  { %v442_v6 = vsel %vm423_vm0, %v862_v5, 0.0 }
 0x133   :  { %443 = vadd.xlane.f32.xlu1 %v442_v6 }
 0x136   :  { %v429_v7 = vpop.xlane.xlu0 %428 }
 0x137   :  { %v434_v8 = vsub.f32 %v315_v56, %v429_v7 }
 0x139   :  { %v438_v9 = vmul.f32 1.442695, %v434_v8 }
 0x13b   :  { %863 = vpow2.f32 %v438_v9 }
 0x141   :  { %v1060_v10 = vpop.eup %863 }
 0x142   :  { %v445_v11 = vsel %vm423_vm0, %v1060_v10, 0.0 }
 0x143   :  { %446 = vadd.xlane.f32.xlu2 %v445_v11 }
 0x146   :  { %v432_v12 = vpop.xlane.xlu1 %431 }
 0x147   :  { %v435_v13 = vsub.f32 %v421_v0, %v432_v12 }
 0x149   :  { %v440_v14 = vmul.f32 1.442695, %v435_v13 }
 0x14b   :  { %865 = vpow2.f32 %v440_v14 }
 0x151   :  { %v1064_v15 = vpop.eup %865 }
 0x152   :  { %v448_v16 = vsel %vm423_vm0, %v1064_v15, 0.0 }
 0x153   :  { %449 = vadd.xlane.f32.xlu2 %v448_v16 }
 0x1a6   :  { %v444_v29 = vpop.xlane.xlu1 %443 }
 0x1a7   :  { %867 = vrcp.f32 %v444_v29 }
 0x1ad   :  { %v868_v33 = vpop.eup %867 }
 0x1ae   :  { %v454_v34 = vmul.f32 %v868_v33, %v862_v5 }
 0x1b0   :  { %v463_v35 = vmul.f32 1.4285715, %v454_v34 }
 0x1b2   :  { %v466_v36 = vsel %vm460_vm2, %v463_v35, 0.0 }
 0x1b3   :  { %829 = vmatmul.msk.f32.vlgmr.msrb.gmra.mxu0 %vm478_vm3, %v466_v36  ;;  %831 = vmatmul.msk.f32.vlgmr.msrb.gmra.mxu1 %vm478_vm3, %v466_v36 }
 0x1b4   :  { %833 = vmatmul.msk.f32.vlgmr.msrb.gmra.mxu2 %vm478_vm3, %v466_v36  ;;  %835 = vmatmul.msk.f32.vlgmr.msrb.gmra.mxu3 %vm478_vm3, %v466_v36 }
 0x1b5   :  { %850 = vmatpush.msk.msrb.mxu3 %vm482_vm1, %v679_v37  ;;  %844 = vmatpush.msk.msrb.mxu0 %vm482_vm1, %v676_v38 }
 0x1b6   :  { %v447_v41 = vpop.xlane.xlu2 %446  ;;  %846 = vmatpush.msk.msrb.mxu1 %vm482_vm1, %v677_v39  ;;  %848 = vmatpush.msk.msrb.mxu2 %vm482_vm1, %v678_v40 }
 0x1b7   :  { %869 = vrcp.f32 %v447_v41 }
 0x1bd   :  { %v870_v43 = vpop.eup %869 }
 0x1be   :  { %v455_v44 = vmul.f32 %v870_v43, %v1060_v10 }
 0x1c0   :  { %v464_v45 = vmul.f32 1.4285715, %v455_v44 }
 0x1c2   :  { %v467_v46 = vsel %vm461_vm4, %v464_v45, 0.0 }
 0x1c3   :  { %837 = vmatmul.msk.f32.vlgmr.msra.gmra.mxu0 %vm478_vm3, %v467_v46  ;;  %839 = vmatmul.msk.f32.vlgmr.msra.gmra.mxu1 %vm478_vm3, %v467_v46 }
 0x1c4   :  { %841 = vmatmul.msk.f32.vlgmr.msra.gmra.mxu2 %vm478_vm3, %v467_v46  ;;  %843 = vmatmul.msk.f32.vlgmr.msra.gmra.mxu3 %vm478_vm3, %v467_v46 }
 0x1c6   :  { %v450_v47 = vpop.xlane.xlu2 %449 }
 0x1c7   :  { %871 = vrcp.f32 %v450_v47 }
 0x1cd   :  { %v872_v49 = vpop.eup %871 }
 0x1ce   :  { %v456_v50 = vmul.f32 %v872_v49, %v1064_v15 }
 0x1d0   :  { %v465_v51 = vmul.f32 1.4285715, %v456_v50 }
 0x1d2   :  { %v468_v52 = vsel %vm462_vm5, %v465_v51, 0.0 }
 0x1d3   :  { %845 = vmatmul.msk.f32.vlgmr.msrb.gmra.mxu0 %vm478_vm3, %v468_v52  ;;  %847 = vmatmul.msk.f32.vlgmr.msrb.gmra.mxu1 %vm478_vm3, %v468_v52 }
 0x1d4   :  { %849 = vmatmul.msk.f32.vlgmr.msrb.gmra.mxu2 %vm478_vm3, %v468_v52  ;;  %851 = vmatmul.msk.f32.vlgmr.msrb.gmra.mxu3 %vm478_vm3, %v468_v52 }
 0x230   :  { %v528_v53 = vpop.f32.mrf.mxu1  ;;  %v508_v55 = vpop.f32.mrf.mxu0 }
 0x231   :  { %v783_v54 = vrot.slane %v528_v53, 4 }
 0x233   :  { %v789_v56 = vsel %vm482_vm1, %v508_v55, %v783_v54 }
 0x234   :  { %801 = vst [vmem:[#allocation10] sm:$0xff] %v789_v56 }
 0x237   :  { %v568_v57 = vpop.f32.mrf.mxu3  ;;  %v548_v59 = vpop.f32.mrf.mxu2 }
 0x238   :  { %v784_v58 = vrot.slane %v568_v57, 4 }
 0x23a   :  { %v790_v60 = vsel %vm482_vm1, %v548_v59, %v784_v58 }
 0x23b   :  { %802 = vst [vmem:[#allocation10 + $0x8] sm:$0xff] %v790_v60 }
 0x240   :  { %v628_v61 = vpop.f32.mrf.mxu1  ;;  %v608_v63 = vpop.f32.mrf.mxu0 }
 0x241   :  { %v785_v62 = vrot.slane %v628_v61, 4 }
 0x243   :  { %v791_v0 = vsel %vm482_vm1, %v608_v63, %v785_v62 }
 0x244   :  { %803 = vst [vmem:[#allocation10 + $0x10] sm:$0xff] %v791_v0 }
 0x247   :  { %v668_v1 = vpop.f32.mrf.mxu3  ;;  %v648_v3 = vpop.f32.mrf.mxu2 }
 0x248   :  { %v786_v2 = vrot.slane %v668_v1, 4 }
 0x24a   :  { %v792_v4 = vsel %vm482_vm1, %v648_v3, %v786_v2 }
 0x24b   :  { %804 = vst [vmem:[#allocation10 + $0x18] sm:$0xff] %v792_v4 }
 0x250   :  { %v728_v5 = vpop.f32.mrf.mxu1  ;;  %v708_v7 = vpop.f32.mrf.mxu0 }
 0x251   :  { %v787_v6 = vrot.slane %v728_v5, 4 }
 0x253   :  { %v793_v8 = vsel %vm482_vm1, %v708_v7, %v787_v6 }
 0x254   :  { %805 = vst [vmem:[#allocation10 + $0x20] sm:$0xff] %v793_v8 }
 0x257   :  { %v768_v9 = vpop.f32.mrf.mxu3  ;;  %v748_v11 = vpop.f32.mrf.mxu2 }
 0x258   :  { %v788_v10 = vrot.slane %v768_v9, 4 }
 0x25a   :  { %v794_v12 = vsel %vm482_vm1, %v748_v11, %v788_v10 }
 0x25b   :  { %806 = vst [vmem:[#allocation10 + $0x28] sm:$0xff] %v794_v12 }
 0x25c   :  { %819 = dma.vmem_to_hbm [thread:$0]  %s812_s10, 768, %s814_s13, [#allocation4], %s1002_s23, %s1002_s23, %s1003_s24  }
 0x25d   :  { %999 = dma.done.wait [#allocation4], 768  }
 0x25e   :  { %1000 = vsyncadd [#allocation4], 4294966528 }
 0x25f   :  { %824 = vsyncpa [#allocation3], 1 }
 0x260   :  { %825 = vsyncpa [#allocation6], 1 }
 0x261   :  { %826 = vsyncpa [#allocation9], 1 }
 0x262   :  { %827 = vsyncpa [#allocation4], 1 }

</bundles_post_ra>
